<compile_context>
chip_gen: v6e
topology: v6e:2x2x1
jax: 0.10.0
libtpu: 0.0.40
codegen_flags: <defaults>
</compile_context>

<pallas_src>
import jax
import jax.numpy as jnp
from jax.experimental import pallas as pl
from jax.experimental.pallas import tpu as pltpu

EPS = 1e-5

_MAX_TILE_ROWS = 1024        # v5e/v6e: already ~85% of HBM roofline at 512-1024 rows
_MAX_TILE_ROWS_V7X = 2048    # v7x: 3.2 TB/s HBM -> bigger blocks amortize ~0.35us/step
_VMEM_LIMIT_BYTES = 48 * 1024 * 1024  # <= v7x's 64 MiB physical; ample on 128 MiB parts


def _round_up(n, m):
    return ((n + m - 1) // m) * m


def _is_v7x():
    # Conservative chip check; default to the single-TC (no-split) path on failure.
    try:
        return "v7" in jax.devices()[0].device_kind.lower()
    except Exception:
        return False


def _per_block_budget_bytes(itemsize, is_v7x):
    if not is_v7x:
        # 128 MiB VMEM parts: a 6 MiB input block -> ~24 MiB of double-buffered
        # I/O plus f32 temporaries, well under the 48 MiB limit.
        return 6 * 1024 * 1024
    # v7x has only 64 MiB physical VMEM. Resident footprint for block size B:
    #   ~4B for double-buffered in+out, plus ~2 full-tile f32 temporaries
    #   (2 * (4/itemsize) * B) inside the kernel. Keep the total <= ~40 MiB.
    temp_factor = 2 * (4 // itemsize)
    return (40 * 1024 * 1024) // (4 + temp_factor)


def _choose_tile_rows(rows, emb_dim, itemsize, is_v7x):
    """Largest sublane-aligned row tile that fits the per-generation VMEM budget."""
    # Sublane multiple: 8 rows for 4-byte dtypes, 16 for bf16, 32 for 1-byte.
    row_mult = 8 * max(1, 4 // itemsize)
    budget = _per_block_budget_bytes(itemsize, is_v7x)
    max_rows = _MAX_TILE_ROWS_V7X if is_v7x else _MAX_TILE_ROWS
    cap = (budget // (emb_dim * itemsize)) // row_mult * row_mult
    cap = max(row_mult, min(cap, max_rows))
    # Never larger than the (sublane-rounded) problem itself.
    cap = min(cap, _round_up(rows, row_mult))
    if is_v7x:
        # v7x has 2 TensorCores sharing the "parallel" row axis: keep them balanced.
        if rows > cap:
            steps = pl.cdiv(rows, cap)
            if steps % 2:  # odd step count leaves one core idle for ~1/steps
                steps += 1
                cap = max(row_mult, _round_up(pl.cdiv(rows, steps), row_mult))
        elif rows > row_mult:
            # Would otherwise be a single grid step: split in 2 so both TCs get work.
            cap = max(row_mult, _round_up(pl.cdiv(rows, 2), row_mult))
    return cap


def _layernorm_kernel(x_ref, scale_ref, shift_ref, o_ref):
    # x_ref: (tile_rows, emb_dim) in VMEM. Compute in f32 regardless of input dtype.
    x = x_ref[...].astype(jnp.float32)
    mean = jnp.mean(x, axis=-1, keepdims=True)
    # Two-pass population variance (divide by N): matches torch var(unbiased=False)
    # and avoids the catastrophic cancellation of the one-pass E[x^2]-mean^2 form.
    var = jnp.mean(jnp.square(x - mean), axis=-1, keepdims=True)
    inv_std = jax.lax.rsqrt(var + EPS)
    # scale/shift arrive already in f32 (converted once in the wrapper). Folding
    # inv_std into scale keeps the output expression to a single fused chain.
    o_ref[...] = ((x - mean) * (inv_std * scale_ref[...]) + shift_ref[...]).astype(o_ref.dtype)


@jax.jit
def layernorm(x, scale, shift):
    """LayerNorm over the last axis of x, matching torch.nn-style semantics."""
    orig_shape = x.shape
    emb_dim = orig_shape[-1]
    rows = 1
    for d in orig_shape[:-1]:
        rows *= d
    x2 = x.reshape(rows, emb_dim)
    # Tiny per-feature params: convert to f32 once here, not per grid step.
    scale2 = scale.reshape(1, emb_dim).astype(jnp.float32)
    shift2 = shift.reshape(1, emb_dim).astype(jnp.float32)

    itemsize = jnp.dtype(x.dtype).itemsize
    is_v7x = _is_v7x()
    tile_rows = _choose_tile_rows(rows, emb_dim, itemsize, is_v7x)

    # Ragged last block is handled by Pallas (reads confined to garbage rows whose
    # stores are masked; the reduction is strictly per-row), so no jnp.pad or
    # slice-back copies and no extra HBM passes.
    grid = (pl.cdiv(rows, tile_rows),)

    # TODO(synk): if emb_dim were ever not a multiple of 128, pad the feature axis
    # at the model level (with in-kernel lane masking) to keep stores lane-dense.
    out = pl.pallas_call(
        _layernorm_kernel,
        out_shape=jax.ShapeDtypeStruct((rows, emb_dim), x.dtype),
        grid_spec=pltpu.PrefetchScalarGridSpec(
            num_scalar_prefetch=0,
            grid=grid,
            in_specs=[
                pl.BlockSpec((tile_rows, emb_dim), lambda i: (i, 0)),
                # Constant block index across the grid -> Pallas elides the re-DMA.
                pl.BlockSpec((1, emb_dim), lambda i: (0, 0)),
                pl.BlockSpec((1, emb_dim), lambda i: (0, 0)),
            ],
            out_specs=pl.BlockSpec((tile_rows, emb_dim), lambda i: (i, 0)),
        ),
        compiler_params=pltpu.CompilerParams(
            dimension_semantics=("parallel",),
            vmem_limit_bytes=_VMEM_LIMIT_BYTES,
        ),
    )(x2, scale2, shift2)

    return out.reshape(orig_shape)


if __name__ == "__main__":
    key = jax.random.PRNGKey(0)
    emb_dim = 768
    # Matches `x = torch.rand(2, 4, 768)` from the reference script.
    x = jax.random.uniform(key, (2, 4, emb_dim), dtype=jnp.float32)

    # Parameter init identical to the module's __init__:
    # scale = ones(emb_dim), shift = zeros(emb_dim)
    scale = jnp.ones((emb_dim,), dtype=jnp.float32)
    shift = jnp.zeros((emb_dim,), dtype=jnp.float32)

    def ref_ln(xv, sc, sh):
        mean = jnp.mean(xv, axis=-1, keepdims=True)
        var = jnp.mean((xv - mean) ** 2, axis=-1, keepdims=True)
        return sc * ((xv - mean) / jnp.sqrt(var + EPS)) + sh

    out = jax.block_until_ready(layernorm(x, scale, shift))
    assert jnp.allclose(out, ref_ln(x, scale, shift), atol=1e-5, rtol=1e-5), "mismatch vs reference"

    # Ragged row count (not a multiple of the tile / sublane size): exercises the
    # masked-store tail path with no wrapper-side pad/slice.
    x_tail = jax.random.normal(jax.random.PRNGKey(1), (3, emb_dim), dtype=jnp.float32)
    out_tail = jax.block_until_ready(layernorm(x_tail, scale, shift))
    assert jnp.allclose(out_tail, ref_ln(x_tail, scale, shift), atol=1e-5, rtol=1e-5), "tail mismatch"

    print("KERNEL_OK")
</pallas_src>

<mosaic_0001>
module attributes {stable_mosaic.version = 11 : i64} {
  func.func @_layernorm_kernel(%arg0: i32, %arg1: memref<8x768xf32, #tpu.memory_space<vmem>>, %arg2: memref<1x768xf32, #tpu.memory_space<vmem>>, %arg3: memref<1x768xf32, #tpu.memory_space<vmem>>, %arg4: memref<8x768xf32, #tpu.memory_space<vmem>>) attributes {dimension_semantics = [#tpu.dimension_semantics<parallel>], iteration_bounds = array<i64: 1>, scalar_prefetch = 0 : i64, scratch_operands = 0 : i64, tpu.core_type = #tpu.core_type<tc>, window_params = [{transform_indices = @transform_0, window_bounds = array<i64: 8, 768>}, {pipeline_mode = #tpu.pipeline_mode<synchronous>, transform_indices = @transform_1, window_bounds = array<i64: 1, 768>}, {pipeline_mode = #tpu.pipeline_mode<synchronous>, transform_indices = @transform_2, window_bounds = array<i64: 1, 768>}, {transform_indices = @transform_3, window_bounds = array<i64: 8, 768>}]} {
    %c0 = arith.constant 0 : index
    %c0_0 = arith.constant 0 : index
    %0 = vector.load %arg1[%c0, %c0_0] : memref<8x768xf32, #tpu.memory_space<vmem>>, vector<8x768xf32>
    %cst = arith.constant dense<0.000000e+00> : vector<8xf32>
    %1 = vector.multi_reduction <add>, %0, %cst [1] : vector<8x768xf32> to vector<8xf32>
    %2 = vector.shape_cast %1 : vector<8xf32> to vector<8x1xf32>
    %cst_1 = arith.constant 7.680000e+02 : f32
    %3 = vector.broadcast %cst_1 : f32 to vector<8x1xf32>
    %4 = arith.divf %2, %3 : vector<8x1xf32>
    %5 = vector.broadcast %4 : vector<8x1xf32> to vector<8x768xf32>
    %6 = arith.subf %0, %5 : vector<8x768xf32>
    %7 = arith.mulf %6, %6 : vector<8x768xf32>
    %cst_2 = arith.constant dense<0.000000e+00> : vector<8xf32>
    %8 = vector.multi_reduction <add>, %7, %cst_2 [1] : vector<8x768xf32> to vector<8xf32>
    %9 = vector.shape_cast %8 : vector<8xf32> to vector<8x1xf32>
    %cst_3 = arith.constant 7.680000e+02 : f32
    %10 = vector.broadcast %cst_3 : f32 to vector<8x1xf32>
    %11 = arith.divf %9, %10 : vector<8x1xf32>
    %cst_4 = arith.constant 9.99999974E-6 : f32
    %12 = vector.broadcast %cst_4 : f32 to vector<8x1xf32>
    %13 = arith.addf %11, %12 : vector<8x1xf32>
    %14 = math.rsqrt %13 : vector<8x1xf32>
    %15 = vector.broadcast %4 : vector<8x1xf32> to vector<8x768xf32>
    %16 = arith.subf %0, %15 : vector<8x768xf32>
    %c0_5 = arith.constant 0 : index
    %c0_6 = arith.constant 0 : index
    %17 = vector.load %arg2[%c0_5, %c0_6] : memref<1x768xf32, #tpu.memory_space<vmem>>, vector<1x768xf32>
    %18 = vector.broadcast %14 : vector<8x1xf32> to vector<8x768xf32>
    %19 = vector.broadcast %17 : vector<1x768xf32> to vector<8x768xf32>
    %20 = arith.mulf %18, %19 : vector<8x768xf32>
    %21 = arith.mulf %16, %20 : vector<8x768xf32>
    %c0_7 = arith.constant 0 : index
    %c0_8 = arith.constant 0 : index
    %22 = vector.load %arg3[%c0_7, %c0_8] : memref<1x768xf32, #tpu.memory_space<vmem>>, vector<1x768xf32>
    %23 = vector.broadcast %22 : vector<1x768xf32> to vector<8x768xf32>
    %24 = arith.addf %21, %23 : vector<8x768xf32>
    %c0_9 = arith.constant 0 : index
    %c0_10 = arith.constant 0 : index
    %25 = vector.load %arg4[%c0_9, %c0_10] : memref<8x768xf32, #tpu.memory_space<vmem>>, vector<8x768xf32>
    tpu.vector_store %arg4[%c0_9, %c0_10], %24 {strides = array<i32>} : memref<8x768xf32, #tpu.memory_space<vmem>>, vector<8x768xf32>,
    return
  }
  func.func @transform_0(%arg0: i32) -> (i32, i32) {
    %c0_i32 = arith.constant 0 : i32
    %c0_i32_0 = arith.constant 0 : i32
    return %arg0, %c0_i32 : i32, i32
  }
  func.func @transform_1(%arg0: i32) -> (i32, i32) {
    %c0_i32 = arith.constant 0 : i32
    %c0_i32_0 = arith.constant 0 : i32
    %c0_i32_1 = arith.constant 0 : i32
    return %c0_i32, %c0_i32_0 : i32, i32
  }
  func.func @transform_2(%arg0: i32) -> (i32, i32) {
    %c0_i32 = arith.constant 0 : i32
    %c0_i32_0 = arith.constant 0 : i32
    %c0_i32_1 = arith.constant 0 : i32
    return %c0_i32, %c0_i32_0 : i32, i32
  }
  func.func @transform_3(%arg0: i32) -> (i32, i32) {
    %c0_i32 = arith.constant 0 : i32
    %c0_i32_0 = arith.constant 0 : i32
    return %arg0, %c0_i32 : i32, i32
  }
}

</mosaic_0001>

<bundles_post_ra>
// kernel: layernorm.1
= control target key start
LH: loop header
LB: loop body
LE: loop exit
PB: predicated region body
PF: predicated region fallthrough
CT: control target
= control target key end

     0   :  { %v53_v32 = vlaneseq  ;;  %s207_s0 = inlined_call_operand.vmem [shape: f32[8,768], index: 0, kind: input, shape index: {}]   ;;  %s208_s1 = inlined_call_operand.vmem [shape: f32[1,768], index: 1, kind: input, shape index: {}]   ;;  %s209_s2 = inlined_call_operand.vmem [shape: f32[1,768], index: 2, kind: input, shape index: {}]   ;;  %s210_s3 = inlined_call_operand.vmem [shape: f32[8,768], index: 3, kind: output, shape index: {}]  }
   0x1   :  { %v14_v0 = vld [vmem:[%s207_s0] sm:$0xff]  ;;  %v15_v1 = vld [vmem:[%s207_s0 + $0x8] sm:$0xff]  ;;  %v16_v2 = vld [vmem:[%s207_s0 + $0x10] sm:$0xff] }
   0x2   :  { %v20_v3 = vadd.f32 %v15_v1, %v14_v0  ;;  %v17_v4 = vld [vmem:[%s207_s0 + $0x18] sm:$0xff]  ;;  %v18_v6 = vld [vmem:[%s207_s0 + $0x20] sm:$0xff]  ;;  %v19_v8 = vld [vmem:[%s207_s0 + $0x28] sm:$0xff]  ;;  %v54_v34 = vshrl.u32 %v53_v32, 7 }
   0x3   :  { %v51_v39 = vld [vmem:[%s208_s1] sm:$0x3f] }
   0x4   :  { %v21_v5 = vadd.f32 %v20_v3, %v16_v2  ;;  %v55_v35 = vsub.s32 0, %v54_v34  ;;  %v59_v36 = vsub.s32 1, %v54_v34  ;;  %v63_v37 = vsub.s32 2, %v54_v34  ;;  %v95_v46 = vld [vmem:[%s209_s2] sm:$0x3f] }
   0x5   :  { %v67_v38 = vsub.s32 3, %v54_v34  ;;  %v71_v40 = vsub.s32 4, %v54_v34  ;;  %v75_v41 = vsub.s32 5, %v54_v34 }
   0x6   :  { %v22_v7 = vadd.f32 %v21_v5, %v17_v4  ;;  %v56_v42 = vrot.slane %v51_v39, %v55_v35  ;;  %v60_v43 = vrot.slane %v51_v39, %v59_v36  ;;  %v64_v44 = vrot.slane %v51_v39, %v63_v37 }
   0x7   :  { %v68_v45 = vrot.slane %v51_v39, %v67_v38  ;;  %v72_v47 = vrot.slane %v51_v39, %v71_v40  ;;  %v76_v48 = vrot.slane %v51_v39, %v75_v41  ;;  %v100_v50 = vrot.slane %v95_v46, %v55_v35 }
   0x8   :  { %v23_v9 = vadd.f32 %v22_v7, %v18_v6  ;;  %v104_v51 = vrot.slane %v95_v46, %v59_v36  ;;  %v108_v52 = vrot.slane %v95_v46, %v63_v37  ;;  %v112_v53 = vrot.slane %v95_v46, %v67_v38 }
   0x9   :  { %v116_v58 = vrot.slane %v95_v46, %v71_v40  ;;  %v120_v59 = vrot.slane %v95_v46, %v75_v41 }
   0xa   :  { %v24_v10 = vadd.f32 %v23_v9, %v19_v8 }
   0xc   :  { %25 = vadd.xlane.f32.xlu0 %v24_v10 }
  0x95   :  { %v26_v11 = vpop.xlane.xlu0 %25 }
  0x96   :  { %v28_v12 = vmul.f32 0.0013020834, %v26_v11 }
  0x98   :  { %v29_v13 = vsub.f32 %v14_v0, %v28_v12  ;;  %v30_v14 = vsub.f32 %v15_v1, %v28_v12  ;;  %v31_v15 = vsub.f32 %v16_v2, %v28_v12  ;;  %v32_v16 = vsub.f32 %v17_v4, %v28_v12 }
  0x99   :  { %v33_v19 = vsub.f32 %v18_v6, %v28_v12  ;;  %v34_v22 = vsub.f32 %v19_v8, %v28_v12 }
  0x9a   :  { %v35_v17 = vmul.f32 %v29_v13, %v29_v13  ;;  %v36_v18 = vmul.f32 %v30_v14, %v30_v14  ;;  %v37_v20 = vmul.f32 %v31_v15, %v31_v15  ;;  %v38_v23 = vmul.f32 %v32_v16, %v32_v16 }
  0x9b   :  { %v39_v25 = vmul.f32 %v33_v19, %v33_v19  ;;  %v40_v27 = vmul.f32 %v34_v22, %v34_v22 }
  0x9c   :  { %v41_v21 = vadd.f32 %v36_v18, %v35_v17 }
  0x9e   :  { %v42_v24 = vadd.f32 %v41_v21, %v37_v20 }
  0xa0   :  { %v43_v26 = vadd.f32 %v42_v24, %v38_v23 }
  0xa2   :  { %v44_v28 = vadd.f32 %v43_v26, %v39_v25 }
  0xa4   :  { %v45_v29 = vadd.f32 %v44_v28, %v40_v27 }
  0xa6   :  { %46 = vadd.xlane.f32.xlu0 %v45_v29 }
 0x12f   :  { %v47_v30 = vpop.xlane.xlu0 %46 }
 0x130   :  { %v48_v31 = vmul.f32 0.0013020834, %v47_v30 }
 0x132   :  { %v49_v33 = vadd.f32 1e-05, %v48_v31 }
 0x134   :  { %143 = vrsqrt.f32 %v49_v33 }
 0x141   :  { %v144_v49 = vpop.eup %143 }
 0x142   :  { %v83_v54 = vmul.f32 %v144_v49, %v56_v42  ;;  %v84_v55 = vmul.f32 %v144_v49, %v60_v43  ;;  %v85_v56 = vmul.f32 %v144_v49, %v64_v44  ;;  %v86_v57 = vmul.f32 %v144_v49, %v68_v45 }
 0x143   :  { %v87_v60 = vmul.f32 %v144_v49, %v72_v47  ;;  %v88_v61 = vmul.f32 %v144_v49, %v76_v48 }
 0x144   :  { %v89_v62 = vmul.f32 %v83_v54, %v29_v13  ;;  %v90_v63 = vmul.f32 %v84_v55, %v30_v14  ;;  %v91_v0 = vmul.f32 %v85_v56, %v31_v15  ;;  %v92_v1 = vmul.f32 %v86_v57, %v32_v16 }
 0x145   :  { %v93_v2 = vmul.f32 %v87_v60, %v33_v19  ;;  %v94_v3 = vmul.f32 %v88_v61, %v34_v22 }
 0x146   :  { %v127_v4 = vadd.f32 %v100_v50, %v89_v62  ;;  %v128_v5 = vadd.f32 %v104_v51, %v90_v63  ;;  %v129_v6 = vadd.f32 %v108_v52, %v91_v0  ;;  %v130_v7 = vadd.f32 %v112_v53, %v92_v1 }
 0x147   :  { %v131_v8 = vadd.f32 %v116_v58, %v93_v2  ;;  %v132_v9 = vadd.f32 %v120_v59, %v94_v3 }
 0x148   :  { %133 = vst [vmem:[%s210_s3] sm:$0xff] %v127_v4  ;;  %134 = vst [vmem:[%s210_s3 + $0x8] sm:$0xff] %v128_v5 }
 0x149   :  { %135 = vst [vmem:[%s210_s3 + $0x10] sm:$0xff] %v129_v6  ;;  %136 = vst [vmem:[%s210_s3 + $0x18] sm:$0xff] %v130_v7 }
 0x14a   :  { %137 = vst [vmem:[%s210_s3 + $0x20] sm:$0xff] %v131_v8  ;;  %138 = vst [vmem:[%s210_s3 + $0x28] sm:$0xff] %v132_v9 }

</bundles_post_ra>
